<compile_context>
chip_gen: v5e
topology: v5e:2x2
jax: 0.10.0
libtpu: 0.0.40
codegen_flags: <defaults>
</compile_context>

<pallas_src>
import functools

import jax
import jax.numpy as jnp
from jax import lax
from jax.experimental import pallas as pl
from jax.experimental.pallas import tpu as pltpu  # noqa: F401  (TPU backend)


def gru_fc_kernel(x_ref, w_i_ref, w_h_ref, b_gi_ref, b_hn_ref,
                  wfc_ref, bfc_ref, out_ref, *,
                  seq_len, batch_pad, batch, hidden):
    """Whole GRU(T steps) + final Linear in one invocation.

    x_ref   : (T*B_pad, I) bf16, time-major rows (row t*B_pad + b = step t, batch b;
              rows b >= batch are zero padding to the 8-row sublane granule)
    w_i_ref : (I, 3H)  bf16 fused input weights  [r | z | n]
    w_h_ref : (H, 3H)  bf16 fused hidden weights [r | z | n]
    b_gi_ref: (1, 3H)  f32 fused input-projection bias
              [b_ir+b_hr | b_iz+b_hz | b_in]
    b_hn_ref: (1, H)   f32 hidden-side n bias (stays inside r * (...))
    wfc_ref : (H, 96)  bf16 final linear weights
    bfc_ref : (1, 96)  f32 final linear bias
    out_ref : (B, 96)  f32 output
    """
    T, BP, H = seq_len, batch_pad, hidden
    H2 = 2 * H
    f32 = jnp.float32

    # Hoisted, fused input projection: ONE MXU matmul for all gates & steps.
    gi = jnp.dot(x_ref[...], w_i_ref[...],
                 preferred_element_type=f32) + b_gi_ref[...]       # (T*BP, 3H)

    w_h = w_h_ref[...]          # (H, 3H) bf16 — single fused RHS, reused every step
    b_hn = b_hn_ref[...]        # (1, H)  f32

    h = jnp.zeros((BP, H), f32)                     # hidden state lives in vregs

    # T is small and static: fully unrolled loop; all slices are static and
    # sublane/lane aligned (BP == 8, gate boundaries at lanes 0 / H / 2H).
    for t in range(T):
        lo = t * BP
        gi_t = gi[lo:lo + BP, :]                                   # (BP, 3H)
        # Single fused hidden matmul per step (serial dependency chain).
        gh = jnp.dot(h.astype(jnp.bfloat16), w_h,
                     preferred_element_type=f32)                   # (BP, 3H)
        # One EUP sigmoid pass covers both r and z (contiguous [:, :2H] lanes).
        rz = jax.nn.sigmoid(gi_t[:, :H2] + gh[:, :H2])
        r = rz[:, :H]
        z = rz[:, H:H2]
        n = jnp.tanh(gi_t[:, H2:] + r * (gh[:, H2:] + b_hn))
        h = n + z * (h - n)                          # == (1 - z) * n + z * h

    # Final Linear on the last hidden state of the real (unpadded) batch rows.
    out_ref[...] = (jnp.dot(h[:batch, :].astype(jnp.bfloat16), wfc_ref[...],
                            preferred_element_type=f32) + bfc_ref[...])


def _prepare_params(params, hidden_size):
    """One-time param prep: fused gate weights, bias folding, bf16 MXU operands."""
    w_ih, w_hh, b_ih, b_hh, w_fc, b_fc = params
    H = hidden_size
    bf16 = jnp.bfloat16
    w_i_all = w_ih.astype(bf16)                                    # (I, 3H)
    w_h_all = w_hh.astype(bf16)                                    # (H, 3H)
    # Fused input-projection bias: r/z get both biases folded; n only the
    # input-side bias (hidden-side b_hn must stay inside r * (...)).
    b_gi = jnp.concatenate(
        [b_ih[:, :2 * H] + b_hh[:, :2 * H], b_ih[:, 2 * H:]], axis=1)  # (1, 3H)
    b_hn = b_hh[:, 2 * H:]                                         # (1, H)
    return (w_i_all, w_h_all, b_gi, b_hn, w_fc.astype(bf16), b_fc)


def gru_model_forward(x, params):
    """x: (B, T, I) float32 (batch_first, matching PyTorch). Returns (B, 96)."""
    B, T, I = x.shape
    H = params[1].shape[0]
    O = params[4].shape[1]
    B_PAD = max(8, ((B + 7) // 8) * 8)          # f32 sublane granule

    prepped = _prepare_params(params, H)

    # Time-major rows with the batch dim padded to the sublane granule:
    # row t*B_PAD + b is timestep t of batch element b; padded rows are zero
    # and only inflate the hoisted (off-critical-path) input matmul.
    x_tm = jnp.transpose(x, (1, 0, 2))                             # (T, B, I)
    x_tm = jnp.pad(x_tm, ((0, 0), (0, B_PAD - B), (0, 0)))
    x_tm = x_tm.reshape(T * B_PAD, I).astype(jnp.bfloat16)

    kernel = functools.partial(gru_fc_kernel, seq_len=T, batch_pad=B_PAD,
                               batch=B, hidden=H)

    # Single invocation, no grid: every operand is one full-array VMEM block
    # (KB-scale), weights DMA'd exactly once, no pipelining overhead.
    # TODO(synk): for large B on v7x, add a leading "parallel" batch grid axis
    # to shard independent sequences across the 2 TensorCores.
    return pl.pallas_call(
        kernel,
        out_shape=jax.ShapeDtypeStruct((B, O), jnp.float32),
    )(x_tm, *prepped)


def gru_model_reference(x, params):
    """Pure-JAX f32 reference matching torch.nn.GRU + Linear semantics."""
    w_ih, w_hh, b_ih, b_hh, w_fc, b_fc = params
    B, T, I = x.shape
    H = w_hh.shape[0]

    def step(h, x_t):
        gi = x_t @ w_ih + b_ih
        gh = h @ w_hh + b_hh
        i_r, i_z, i_n = gi[:, :H], gi[:, H:2 * H], gi[:, 2 * H:]
        h_r, h_z, h_n = gh[:, :H], gh[:, H:2 * H], gh[:, 2 * H:]
        r = jax.nn.sigmoid(i_r + h_r)
        z = jax.nn.sigmoid(i_z + h_z)
        n = jnp.tanh(i_n + r * h_n)
        h_new = (1.0 - z) * n + z * h
        return h_new, None

    h0 = jnp.zeros((B, H), jnp.float32)
    h_last, _ = lax.scan(step, h0, jnp.transpose(x, (1, 0, 2)))
    return h_last @ w_fc + b_fc


def init_params(key, input_size, hidden_size, out_size=96):
    """Deterministic init mirroring PyTorch's uniform(-1/sqrt(H), 1/sqrt(H))."""
    ks = jax.random.split(key, 6)
    bound = 1.0 / jnp.sqrt(jnp.float32(hidden_size))
    # Stored transposed relative to PyTorch (so kernels do x @ W), gate order r|z|n.
    w_ih = jax.random.uniform(ks[0], (input_size, 3 * hidden_size), jnp.float32, -bound, bound)
    w_hh = jax.random.uniform(ks[1], (hidden_size, 3 * hidden_size), jnp.float32, -bound, bound)
    b_ih = jax.random.uniform(ks[2], (1, 3 * hidden_size), jnp.float32, -bound, bound)
    b_hh = jax.random.uniform(ks[3], (1, 3 * hidden_size), jnp.float32, -bound, bound)
    w_fc = jax.random.uniform(ks[4], (hidden_size, out_size), jnp.float32, -bound, bound)
    b_fc = jax.random.uniform(ks[5], (1, out_size), jnp.float32, -bound, bound)
    return (w_ih, w_hh, b_ih, b_hh, w_fc, b_fc)


if __name__ == "__main__":
    # Small shapes consistent with the module: batch=2, seq=8, input=16, hidden=32.
    B, T, I, H = 2, 8, 16, 32
    key = jax.random.PRNGKey(0)
    k_x, k_p = jax.random.split(key)

    x = jax.random.normal(k_x, (B, T, I), jnp.float32)
    params = init_params(k_p, I, H)

    fwd = jax.jit(gru_model_forward)
    out = jax.block_until_ready(fwd(x, params))

    ref = jax.block_until_ready(gru_model_reference(x, params))
    assert out.shape == (B, 96), out.shape
    # bf16 MXU operands (f32 accumulation) vs a pure-f32 reference -> looser tol.
    assert jnp.allclose(out, ref, atol=5e-2, rtol=5e-2), (
        f"max abs err {jnp.max(jnp.abs(out - ref))}")

    print("KERNEL_OK")
</pallas_src>

<mosaic_0001>
module attributes {stable_mosaic.version = 11 : i64} {
  func.func @gru_fc_kernel(%arg0: memref<64x16xbf16, #tpu.memory_space<vmem>>, %arg1: memref<16x96xbf16, #tpu.memory_space<vmem>>, %arg2: memref<32x96xbf16, #tpu.memory_space<vmem>>, %arg3: memref<1x96xf32, #tpu.memory_space<vmem>>, %arg4: memref<1x32xf32, #tpu.memory_space<vmem>>, %arg5: memref<32x96xbf16, #tpu.memory_space<vmem>>, %arg6: memref<1x96xf32, #tpu.memory_space<vmem>>, %arg7: memref<2x96xf32, #tpu.memory_space<vmem>>) attributes {dimension_semantics = [], scalar_prefetch = 0 : i64, scratch_operands = 0 : i64, tpu.core_type = #tpu.core_type<tc>} {
    %c0 = arith.constant 0 : index
    %c0_0 = arith.constant 0 : index
    %0 = vector.load %arg0[%c0, %c0_0] : memref<64x16xbf16, #tpu.memory_space<vmem>>, vector<64x16xbf16>
    %c0_1 = arith.constant 0 : index
    %c0_2 = arith.constant 0 : index
    %1 = vector.load %arg1[%c0_1, %c0_2] : memref<16x96xbf16, #tpu.memory_space<vmem>>, vector<16x96xbf16>
    %cst = arith.constant dense<0.000000e+00> : vector<64x96xf32>
    %2 = tpu.matmul %0, %1, %cst {dimension_numbers = #tpu.dot_dimension_numbers<[1], [0], [0], [1], [0, 0, 1, 1], [], []>} : vector<64x16xbf16>, vector<16x96xbf16>, vector<64x96xf32> -> vector<64x96xf32>
    %c0_3 = arith.constant 0 : index
    %c0_4 = arith.constant 0 : index
    %3 = vector.load %arg3[%c0_3, %c0_4] : memref<1x96xf32, #tpu.memory_space<vmem>>, vector<1x96xf32>
    %4 = vector.broadcast %3 : vector<1x96xf32> to vector<64x96xf32>
    %5 = arith.addf %2, %4 : vector<64x96xf32>
    %c0_5 = arith.constant 0 : index
    %c0_6 = arith.constant 0 : index
    %6 = vector.load %arg2[%c0_5, %c0_6] : memref<32x96xbf16, #tpu.memory_space<vmem>>, vector<32x96xbf16>
    %c0_7 = arith.constant 0 : index
    %c0_8 = arith.constant 0 : index
    %7 = vector.load %arg4[%c0_7, %c0_8] : memref<1x32xf32, #tpu.memory_space<vmem>>, vector<1x32xf32>
    %cst_9 = arith.constant 0.000000e+00 : f32
    %8 = vector.broadcast %cst_9 : f32 to vector<8x32xf32>
    %9 = vector.extract_strided_slice %5 {offsets = [0, 0], sizes = [8, 96], strides = [1, 1]} : vector<64x96xf32> to vector<8x96xf32>
    %10 = arith.truncf %8 : vector<8x32xf32> to vector<8x32xbf16>
    %cst_10 = arith.constant dense<0.000000e+00> : vector<8x96xf32>
    %11 = tpu.matmul %10, %6, %cst_10 {dimension_numbers = #tpu.dot_dimension_numbers<[1], [0], [0], [1], [0, 0, 1, 1], [], []>} : vector<8x32xbf16>, vector<32x96xbf16>, vector<8x96xf32> -> vector<8x96xf32>
    %12 = vector.extract_strided_slice %9 {offsets = [0, 0], sizes = [8, 64], strides = [1, 1]} : vector<8x96xf32> to vector<8x64xf32>
    %13 = vector.extract_strided_slice %11 {offsets = [0, 0], sizes = [8, 64], strides = [1, 1]} : vector<8x96xf32> to vector<8x64xf32>
    %14 = arith.addf %12, %13 : vector<8x64xf32>
    %15 = arith.negf %14 : vector<8x64xf32>
    %16 = math.exp %15 : vector<8x64xf32>
    %cst_11 = arith.constant 1.000000e+00 : f32
    %17 = vector.broadcast %cst_11 : f32 to vector<8x64xf32>
    %18 = arith.addf %17, %16 : vector<8x64xf32>
    %19 = arith.divf %17, %18 : vector<8x64xf32>
    %20 = vector.extract_strided_slice %19 {offsets = [0, 0], sizes = [8, 32], strides = [1, 1]} : vector<8x64xf32> to vector<8x32xf32>
    %21 = vector.extract_strided_slice %19 {offsets = [0, 32], sizes = [8, 32], strides = [1, 1]} : vector<8x64xf32> to vector<8x32xf32>
    %22 = vector.extract_strided_slice %9 {offsets = [0, 64], sizes = [8, 32], strides = [1, 1]} : vector<8x96xf32> to vector<8x32xf32>
    %23 = vector.extract_strided_slice %11 {offsets = [0, 64], sizes = [8, 32], strides = [1, 1]} : vector<8x96xf32> to vector<8x32xf32>
    %24 = vector.broadcast %7 : vector<1x32xf32> to vector<8x32xf32>
    %25 = arith.addf %23, %24 : vector<8x32xf32>
    %26 = arith.mulf %20, %25 : vector<8x32xf32>
    %27 = arith.addf %22, %26 : vector<8x32xf32>
    %28 = math.tanh %27 : vector<8x32xf32>
    %29 = arith.subf %8, %28 : vector<8x32xf32>
    %30 = arith.mulf %21, %29 : vector<8x32xf32>
    %31 = arith.addf %28, %30 : vector<8x32xf32>
    %32 = vector.extract_strided_slice %5 {offsets = [8, 0], sizes = [8, 96], strides = [1, 1]} : vector<64x96xf32> to vector<8x96xf32>
    %33 = arith.truncf %31 : vector<8x32xf32> to vector<8x32xbf16>
    %cst_12 = arith.constant dense<0.000000e+00> : vector<8x96xf32>
    %34 = tpu.matmul %33, %6, %cst_12 {dimension_numbers = #tpu.dot_dimension_numbers<[1], [0], [0], [1], [0, 0, 1, 1], [], []>} : vector<8x32xbf16>, vector<32x96xbf16>, vector<8x96xf32> -> vector<8x96xf32>
    %35 = vector.extract_strided_slice %32 {offsets = [0, 0], sizes = [8, 64], strides = [1, 1]} : vector<8x96xf32> to vector<8x64xf32>
    %36 = vector.extract_strided_slice %34 {offsets = [0, 0], sizes = [8, 64], strides = [1, 1]} : vector<8x96xf32> to vector<8x64xf32>
    %37 = arith.addf %35, %36 : vector<8x64xf32>
    %38 = arith.negf %37 : vector<8x64xf32>
    %39 = math.exp %38 : vector<8x64xf32>
    %cst_13 = arith.constant 1.000000e+00 : f32
    %40 = vector.broadcast %cst_13 : f32 to vector<8x64xf32>
    %41 = arith.addf %40, %39 : vector<8x64xf32>
    %42 = arith.divf %40, %41 : vector<8x64xf32>
    %43 = vector.extract_strided_slice %42 {offsets = [0, 0], sizes = [8, 32], strides = [1, 1]} : vector<8x64xf32> to vector<8x32xf32>
    %44 = vector.extract_strided_slice %42 {offsets = [0, 32], sizes = [8, 32], strides = [1, 1]} : vector<8x64xf32> to vector<8x32xf32>
    %45 = vector.extract_strided_slice %32 {offsets = [0, 64], sizes = [8, 32], strides = [1, 1]} : vector<8x96xf32> to vector<8x32xf32>
    %46 = vector.extract_strided_slice %34 {offsets = [0, 64], sizes = [8, 32], strides = [1, 1]} : vector<8x96xf32> to vector<8x32xf32>
    %47 = vector.broadcast %7 : vector<1x32xf32> to vector<8x32xf32>
    %48 = arith.addf %46, %47 : vector<8x32xf32>
    %49 = arith.mulf %43, %48 : vector<8x32xf32>
    %50 = arith.addf %45, %49 : vector<8x32xf32>
    %51 = math.tanh %50 : vector<8x32xf32>
    %52 = arith.subf %31, %51 : vector<8x32xf32>
    %53 = arith.mulf %44, %52 : vector<8x32xf32>
    %54 = arith.addf %51, %53 : vector<8x32xf32>
    %55 = vector.extract_strided_slice %5 {offsets = [16, 0], sizes = [8, 96], strides = [1, 1]} : vector<64x96xf32> to vector<8x96xf32>
    %56 = arith.truncf %54 : vector<8x32xf32> to vector<8x32xbf16>
    %cst_14 = arith.constant dense<0.000000e+00> : vector<8x96xf32>
    %57 = tpu.matmul %56, %6, %cst_14 {dimension_numbers = #tpu.dot_dimension_numbers<[1], [0], [0], [1], [0, 0, 1, 1], [], []>} : vector<8x32xbf16>, vector<32x96xbf16>, vector<8x96xf32> -> vector<8x96xf32>
    %58 = vector.extract_strided_slice %55 {offsets = [0, 0], sizes = [8, 64], strides = [1, 1]} : vector<8x96xf32> to vector<8x64xf32>
    %59 = vector.extract_strided_slice %57 {offsets = [0, 0], sizes = [8, 64], strides = [1, 1]} : vector<8x96xf32> to vector<8x64xf32>
    %60 = arith.addf %58, %59 : vector<8x64xf32>
    %61 = arith.negf %60 : vector<8x64xf32>
    %62 = math.exp %61 : vector<8x64xf32>
    %cst_15 = arith.constant 1.000000e+00 : f32
    %63 = vector.broadcast %cst_15 : f32 to vector<8x64xf32>
    %64 = arith.addf %63, %62 : vector<8x64xf32>
    %65 = arith.divf %63, %64 : vector<8x64xf32>
    %66 = vector.extract_strided_slice %65 {offsets = [0, 0], sizes = [8, 32], strides = [1, 1]} : vector<8x64xf32> to vector<8x32xf32>
    %67 = vector.extract_strided_slice %65 {offsets = [0, 32], sizes = [8, 32], strides = [1, 1]} : vector<8x64xf32> to vector<8x32xf32>
    %68 = vector.extract_strided_slice %55 {offsets = [0, 64], sizes = [8, 32], strides = [1, 1]} : vector<8x96xf32> to vector<8x32xf32>
    %69 = vector.extract_strided_slice %57 {offsets = [0, 64], sizes = [8, 32], strides = [1, 1]} : vector<8x96xf32> to vector<8x32xf32>
    %70 = vector.broadcast %7 : vector<1x32xf32> to vector<8x32xf32>
    %71 = arith.addf %69, %70 : vector<8x32xf32>
    %72 = arith.mulf %66, %71 : vector<8x32xf32>
    %73 = arith.addf %68, %72 : vector<8x32xf32>
    %74 = math.tanh %73 : vector<8x32xf32>
    %75 = arith.subf %54, %74 : vector<8x32xf32>
    %76 = arith.mulf %67, %75 : vector<8x32xf32>
    %77 = arith.addf %74, %76 : vector<8x32xf32>
    %78 = vector.extract_strided_slice %5 {offsets = [24, 0], sizes = [8, 96], strides = [1, 1]} : vector<64x96xf32> to vector<8x96xf32>
    %79 = arith.truncf %77 : vector<8x32xf32> to vector<8x32xbf16>
    %cst_16 = arith.constant dense<0.000000e+00> : vector<8x96xf32>
    %80 = tpu.matmul %79, %6, %cst_16 {dimension_numbers = #tpu.dot_dimension_numbers<[1], [0], [0], [1], [0, 0, 1, 1], [], []>} : vector<8x32xbf16>, vector<32x96xbf16>, vector<8x96xf32> -> vector<8x96xf32>
    %81 = vector.extract_strided_slice %78 {offsets = [0, 0], sizes = [8, 64], strides = [1, 1]} : vector<8x96xf32> to vector<8x64xf32>
    %82 = vector.extract_strided_slice %80 {offsets = [0, 0], sizes = [8, 64], strides = [1, 1]} : vector<8x96xf32> to vector<8x64xf32>
    %83 = arith.addf %81, %82 : vector<8x64xf32>
    %84 = arith.negf %83 : vector<8x64xf32>
    %85 = math.exp %84 : vector<8x64xf32>
    %cst_17 = arith.constant 1.000000e+00 : f32
    %86 = vector.broadcast %cst_17 : f32 to vector<8x64xf32>
    %87 = arith.addf %86, %85 : vector<8x64xf32>
    %88 = arith.divf %86, %87 : vector<8x64xf32>
    %89 = vector.extract_strided_slice %88 {offsets = [0, 0], sizes = [8, 32], strides = [1, 1]} : vector<8x64xf32> to vector<8x32xf32>
    %90 = vector.extract_strided_slice %88 {offsets = [0, 32], sizes = [8, 32], strides = [1, 1]} : vector<8x64xf32> to vector<8x32xf32>
    %91 = vector.extract_strided_slice %78 {offsets = [0, 64], sizes = [8, 32], strides = [1, 1]} : vector<8x96xf32> to vector<8x32xf32>
    %92 = vector.extract_strided_slice %80 {offsets = [0, 64], sizes = [8, 32], strides = [1, 1]} : vector<8x96xf32> to vector<8x32xf32>
    %93 = vector.broadcast %7 : vector<1x32xf32> to vector<8x32xf32>
    %94 = arith.addf %92, %93 : vector<8x32xf32>
    %95 = arith.mulf %89, %94 : vector<8x32xf32>
    %96 = arith.addf %91, %95 : vector<8x32xf32>
    %97 = math.tanh %96 : vector<8x32xf32>
    %98 = arith.subf %77, %97 : vector<8x32xf32>
    %99 = arith.mulf %90, %98 : vector<8x32xf32>
    %100 = arith.addf %97, %99 : vector<8x32xf32>
    %101 = vector.extract_strided_slice %5 {offsets = [32, 0], sizes = [8, 96], strides = [1, 1]} : vector<64x96xf32> to vector<8x96xf32>
    %102 = arith.truncf %100 : vector<8x32xf32> to vector<8x32xbf16>
    %cst_18 = arith.constant dense<0.000000e+00> : vector<8x96xf32>
    %103 = tpu.matmul %102, %6, %cst_18 {dimension_numbers = #tpu.dot_dimension_numbers<[1], [0], [0], [1], [0, 0, 1, 1], [], []>} : vector<8x32xbf16>, vector<32x96xbf16>, vector<8x96xf32> -> vector<8x96xf32>
    %104 = vector.extract_strided_slice %101 {offsets = [0, 0], sizes = [8, 64], strides = [1, 1]} : vector<8x96xf32> to vector<8x64xf32>
    %105 = vector.extract_strided_slice %103 {offsets = [0, 0], sizes = [8, 64], strides = [1, 1]} : vector<8x96xf32> to vector<8x64xf32>
    %106 = arith.addf %104, %105 : vector<8x64xf32>
    %107 = arith.negf %106 : vector<8x64xf32>
    %108 = math.exp %107 : vector<8x64xf32>
    %cst_19 = arith.constant 1.000000e+00 : f32
    %109 = vector.broadcast %cst_19 : f32 to vector<8x64xf32>
    %110 = arith.addf %109, %108 : vector<8x64xf32>
    %111 = arith.divf %109, %110 : vector<8x64xf32>
    %112 = vector.extract_strided_slice %111 {offsets = [0, 0], sizes = [8, 32], strides = [1, 1]} : vector<8x64xf32> to vector<8x32xf32>
    %113 = vector.extract_strided_slice %111 {offsets = [0, 32], sizes = [8, 32], strides = [1, 1]} : vector<8x64xf32> to vector<8x32xf32>
    %114 = vector.extract_strided_slice %101 {offsets = [0, 64], sizes = [8, 32], strides = [1, 1]} : vector<8x96xf32> to vector<8x32xf32>
    %115 = vector.extract_strided_slice %103 {offsets = [0, 64], sizes = [8, 32], strides = [1, 1]} : vector<8x96xf32> to vector<8x32xf32>
    %116 = vector.broadcast %7 : vector<1x32xf32> to vector<8x32xf32>
    %117 = arith.addf %115, %116 : vector<8x32xf32>
    %118 = arith.mulf %112, %117 : vector<8x32xf32>
    %119 = arith.addf %114, %118 : vector<8x32xf32>
    %120 = math.tanh %119 : vector<8x32xf32>
    %121 = arith.subf %100, %120 : vector<8x32xf32>
    %122 = arith.mulf %113, %121 : vector<8x32xf32>
    %123 = arith.addf %120, %122 : vector<8x32xf32>
    %124 = vector.extract_strided_slice %5 {offsets = [40, 0], sizes = [8, 96], strides = [1, 1]} : vector<64x96xf32> to vector<8x96xf32>
    %125 = arith.truncf %123 : vector<8x32xf32> to vector<8x32xbf16>
    %cst_20 = arith.constant dense<0.000000e+00> : vector<8x96xf32>
    %126 = tpu.matmul %125, %6, %cst_20 {dimension_numbers = #tpu.dot_dimension_numbers<[1], [0], [0], [1], [0, 0, 1, 1], [], []>} : vector<8x32xbf16>, vector<32x96xbf16>, vector<8x96xf32> -> vector<8x96xf32>
    %127 = vector.extract_strided_slice %124 {offsets = [0, 0], sizes = [8, 64], strides = [1, 1]} : vector<8x96xf32> to vector<8x64xf32>
    %128 = vector.extract_strided_slice %126 {offsets = [0, 0], sizes = [8, 64], strides = [1, 1]} : vector<8x96xf32> to vector<8x64xf32>
    %129 = arith.addf %127, %128 : vector<8x64xf32>
    %130 = arith.negf %129 : vector<8x64xf32>
    %131 = math.exp %130 : vector<8x64xf32>
    %cst_21 = arith.constant 1.000000e+00 : f32
    %132 = vector.broadcast %cst_21 : f32 to vector<8x64xf32>
    %133 = arith.addf %132, %131 : vector<8x64xf32>
    %134 = arith.divf %132, %133 : vector<8x64xf32>
    %135 = vector.extract_strided_slice %134 {offsets = [0, 0], sizes = [8, 32], strides = [1, 1]} : vector<8x64xf32> to vector<8x32xf32>
    %136 = vector.extract_strided_slice %134 {offsets = [0, 32], sizes = [8, 32], strides = [1, 1]} : vector<8x64xf32> to vector<8x32xf32>
    %137 = vector.extract_strided_slice %124 {offsets = [0, 64], sizes = [8, 32], strides = [1, 1]} : vector<8x96xf32> to vector<8x32xf32>
    %138 = vector.extract_strided_slice %126 {offsets = [0, 64], sizes = [8, 32], strides = [1, 1]} : vector<8x96xf32> to vector<8x32xf32>
    %139 = vector.broadcast %7 : vector<1x32xf32> to vector<8x32xf32>
    %140 = arith.addf %138, %139 : vector<8x32xf32>
    %141 = arith.mulf %135, %140 : vector<8x32xf32>
    %142 = arith.addf %137, %141 : vector<8x32xf32>
    %143 = math.tanh %142 : vector<8x32xf32>
    %144 = arith.subf %123, %143 : vector<8x32xf32>
    %145 = arith.mulf %136, %144 : vector<8x32xf32>
    %146 = arith.addf %143, %145 : vector<8x32xf32>
    %147 = vector.extract_strided_slice %5 {offsets = [48, 0], sizes = [8, 96], strides = [1, 1]} : vector<64x96xf32> to vector<8x96xf32>
    %148 = arith.truncf %146 : vector<8x32xf32> to vector<8x32xbf16>
    %cst_22 = arith.constant dense<0.000000e+00> : vector<8x96xf32>
    %149 = tpu.matmul %148, %6, %cst_22 {dimension_numbers = #tpu.dot_dimension_numbers<[1], [0], [0], [1], [0, 0, 1, 1], [], []>} : vector<8x32xbf16>, vector<32x96xbf16>, vector<8x96xf32> -> vector<8x96xf32>
    %150 = vector.extract_strided_slice %147 {offsets = [0, 0], sizes = [8, 64], strides = [1, 1]} : vector<8x96xf32> to vector<8x64xf32>
    %151 = vector.extract_strided_slice %149 {offsets = [0, 0], sizes = [8, 64], strides = [1, 1]} : vector<8x96xf32> to vector<8x64xf32>
    %152 = arith.addf %150, %151 : vector<8x64xf32>
    %153 = arith.negf %152 : vector<8x64xf32>
    %154 = math.exp %153 : vector<8x64xf32>
    %cst_23 = arith.constant 1.000000e+00 : f32
    %155 = vector.broadcast %cst_23 : f32 to vector<8x64xf32>
    %156 = arith.addf %155, %154 : vector<8x64xf32>
    %157 = arith.divf %155, %156 : vector<8x64xf32>
    %158 = vector.extract_strided_slice %157 {offsets = [0, 0], sizes = [8, 32], strides = [1, 1]} : vector<8x64xf32> to vector<8x32xf32>
    %159 = vector.extract_strided_slice %157 {offsets = [0, 32], sizes = [8, 32], strides = [1, 1]} : vector<8x64xf32> to vector<8x32xf32>
    %160 = vector.extract_strided_slice %147 {offsets = [0, 64], sizes = [8, 32], strides = [1, 1]} : vector<8x96xf32> to vector<8x32xf32>
    %161 = vector.extract_strided_slice %149 {offsets = [0, 64], sizes = [8, 32], strides = [1, 1]} : vector<8x96xf32> to vector<8x32xf32>
    %162 = vector.broadcast %7 : vector<1x32xf32> to vector<8x32xf32>
    %163 = arith.addf %161, %162 : vector<8x32xf32>
    %164 = arith.mulf %158, %163 : vector<8x32xf32>
    %165 = arith.addf %160, %164 : vector<8x32xf32>
    %166 = math.tanh %165 : vector<8x32xf32>
    %167 = arith.subf %146, %166 : vector<8x32xf32>
    %168 = arith.mulf %159, %167 : vector<8x32xf32>
    %169 = arith.addf %166, %168 : vector<8x32xf32>
    %170 = vector.extract_strided_slice %5 {offsets = [56, 0], sizes = [8, 96], strides = [1, 1]} : vector<64x96xf32> to vector<8x96xf32>
    %171 = arith.truncf %169 : vector<8x32xf32> to vector<8x32xbf16>
    %cst_24 = arith.constant dense<0.000000e+00> : vector<8x96xf32>
    %172 = tpu.matmul %171, %6, %cst_24 {dimension_numbers = #tpu.dot_dimension_numbers<[1], [0], [0], [1], [0, 0, 1, 1], [], []>} : vector<8x32xbf16>, vector<32x96xbf16>, vector<8x96xf32> -> vector<8x96xf32>
    %173 = vector.extract_strided_slice %170 {offsets = [0, 0], sizes = [8, 64], strides = [1, 1]} : vector<8x96xf32> to vector<8x64xf32>
    %174 = vector.extract_strided_slice %172 {offsets = [0, 0], sizes = [8, 64], strides = [1, 1]} : vector<8x96xf32> to vector<8x64xf32>
    %175 = arith.addf %173, %174 : vector<8x64xf32>
    %176 = arith.negf %175 : vector<8x64xf32>
    %177 = math.exp %176 : vector<8x64xf32>
    %cst_25 = arith.constant 1.000000e+00 : f32
    %178 = vector.broadcast %cst_25 : f32 to vector<8x64xf32>
    %179 = arith.addf %178, %177 : vector<8x64xf32>
    %180 = arith.divf %178, %179 : vector<8x64xf32>
    %181 = vector.extract_strided_slice %180 {offsets = [0, 0], sizes = [8, 32], strides = [1, 1]} : vector<8x64xf32> to vector<8x32xf32>
    %182 = vector.extract_strided_slice %180 {offsets = [0, 32], sizes = [8, 32], strides = [1, 1]} : vector<8x64xf32> to vector<8x32xf32>
    %183 = vector.extract_strided_slice %170 {offsets = [0, 64], sizes = [8, 32], strides = [1, 1]} : vector<8x96xf32> to vector<8x32xf32>
    %184 = vector.extract_strided_slice %172 {offsets = [0, 64], sizes = [8, 32], strides = [1, 1]} : vector<8x96xf32> to vector<8x32xf32>
    %185 = vector.broadcast %7 : vector<1x32xf32> to vector<8x32xf32>
    %186 = arith.addf %184, %185 : vector<8x32xf32>
    %187 = arith.mulf %181, %186 : vector<8x32xf32>
    %188 = arith.addf %183, %187 : vector<8x32xf32>
    %189 = math.tanh %188 : vector<8x32xf32>
    %190 = arith.subf %169, %189 : vector<8x32xf32>
    %191 = arith.mulf %182, %190 : vector<8x32xf32>
    %192 = arith.addf %189, %191 : vector<8x32xf32>
    %193 = vector.extract_strided_slice %192 {offsets = [0, 0], sizes = [2, 32], strides = [1, 1]} : vector<8x32xf32> to vector<2x32xf32>
    %194 = arith.truncf %193 : vector<2x32xf32> to vector<2x32xbf16>
    %c0_26 = arith.constant 0 : index
    %c0_27 = arith.constant 0 : index
    %195 = vector.load %arg5[%c0_26, %c0_27] : memref<32x96xbf16, #tpu.memory_space<vmem>>, vector<32x96xbf16>
    %cst_28 = arith.constant dense<0.000000e+00> : vector<2x96xf32>
    %196 = tpu.matmul %194, %195, %cst_28 {dimension_numbers = #tpu.dot_dimension_numbers<[1], [0], [0], [1], [0, 0, 1, 1], [], []>} : vector<2x32xbf16>, vector<32x96xbf16>, vector<2x96xf32> -> vector<2x96xf32>
    %c0_29 = arith.constant 0 : index
    %c0_30 = arith.constant 0 : index
    %197 = vector.load %arg6[%c0_29, %c0_30] : memref<1x96xf32, #tpu.memory_space<vmem>>, vector<1x96xf32>
    %198 = vector.broadcast %197 : vector<1x96xf32> to vector<2x96xf32>
    %199 = arith.addf %196, %198 : vector<2x96xf32>
    %c0_31 = arith.constant 0 : index
    %c0_32 = arith.constant 0 : index
    %200 = vector.load %arg7[%c0_31, %c0_32] : memref<2x96xf32, #tpu.memory_space<vmem>>, vector<2x96xf32>
    tpu.vector_store %arg7[%c0_31, %c0_32], %199 {strides = array<i32>} : memref<2x96xf32, #tpu.memory_space<vmem>>, vector<2x96xf32>,
    return
  }
}

</mosaic_0001>

<bundles_post_ra>
// kernel: gru_model_forward.1
= control target key start
LH: loop header
LB: loop body
LE: loop exit
PB: predicated region body
PF: predicated region fallthrough
CT: control target
= control target key end

     0   :  { %vm68_vm0 = vcmask 130048   ;;  %s838_s11 = smov 64   ;;  %s1015_s0 = inlined_call_operand.vmem [shape: bf16[64,16], index: 0, kind: input, shape index: {}]   ;;  %s1016_s1 = inlined_call_operand.vmem [shape: bf16[16,96], index: 1, kind: input, shape index: {}]   ;;  %s1017_s2 = inlined_call_operand.vmem [shape: bf16[32,96], index: 2, kind: input, shape index: {}]   ;;  %s1018_s3 = inlined_call_operand.vmem [shape: f32[1,96], index: 3, kind: input, shape index: {}]   ;;  %s1019_s4 = inlined_call_operand.vmem [shape: f32[1,32], index: 4, kind: input, shape index: {}]   ;;  %s1020_s5 = inlined_call_operand.vmem [shape: bf16[32,96], index: 5, kind: input, shape index: {}]   ;;  %s1021_s6 = inlined_call_operand.vmem [shape: f32[1,96], index: 6, kind: input, shape index: {}]   ;;  %s1022_s7 = inlined_call_operand.hbm [shape: f32[2,96], index: 7, kind: output, shape index: {}]  }
   0x1   :  { %v886_v0 = vld [vmem:[%s1017_s2 + $0x8] sm:$0xff]  ;;  %v751_v1 = vld [vmem:[%s1016_s1] sm:$0xff] }
   0x2   :  { %v747_v2 = vld [vmem:[%s1015_s0] sm:$0xff]  ;;  %137 = vmatpush.bf16.msra.mxu1 %v886_v0  ;;  %88 = vmatpush.bf16.msra.mxu0 %v751_v1 }
   0x3   :  { %v761_v3 = vld [vmem:[%s1019_s4] ss:$0 sm:$0xff]  ;;  %205 = vmatpush.bf16.msra.mxu2 %v886_v0 }
   0x4   :  { %v901_v4 = vld [vmem:[%s1017_s2] sm:$0xff]  ;;  %166 = vrot.lane.b32.xlu0 %v761_v3, %s838_s11 }
   0x5   :  { %12 = vsyncpa [#allocation3], 0  ;;  %268 = vmatpush.bf16.msra.mxu3 %v886_v0  ;;  %711 = vmatmul.msk.bf16.vlgmr.msra.gmra.mxu0 %vm68_vm0, %v747_v2  ;;  %v839_v5 = vmov 0   ;;  %v925_v10 = vld [vmem:[%s1018_s3] ss:$0 sm:$0xff]  ;;  %s840_s3 = smov 96  }
   0x6   :  { %138 = vmatpush.bf16.msra.mxu1 %v901_v4  ;;  %s841_s4 = smov 32   ;;  %vm127_vm5 = vcmask 261120   ;;  %s842_s23 = smov [#allocation2]  }
   0x7   :  { %206 = vmatpush.bf16.msra.mxu2 %v901_v4  ;;  %s680_s24 = sshll.u32 %s842_s23, 4  ;;  %s682_s27 = sshll.u32 %s1022_s7, 4  ;;  %s681_s24 = int_to_ptr.vmem [resolvable:$true] %s680_s24  ;;  %s683_s27 = int_to_ptr.hbm [resolvable:$true] %s682_s27 }
   0x9   :  { %269 = vmatpush.bf16.msra.mxu3 %v901_v4  ;;  %139 = vmatmul.bf16.vlgmr.msra.gmra.mxu1 %v839_v5  ;;  %v748_v5 = vld [vmem:[%s1015_s0 + $0x8] sm:$0xff] }
   0xa   :  { %331 = vmatpush.bf16.msrb.mxu1 %v886_v0 }
   0xb   :  { %394 = vmatpush.bf16.msrb.mxu2 %v886_v0 }
   0xd   :  { %457 = vmatpush.bf16.msrb.mxu3 %v886_v0 }
   0xe   :  { %332 = vmatpush.bf16.msrb.mxu1 %v901_v4 }
   0xf   :  { %395 = vmatpush.bf16.msrb.mxu2 %v901_v4 }
  0x11   :  { %458 = vmatpush.bf16.msrb.mxu3 %v901_v4 }
  0x12   :  { %520 = vmatpush.bf16.msra.mxu1 %v886_v0 }
  0x15   :  { %712 = vmatmul.msk.bf16.gmra.mxu0 %vm68_vm0, %v748_v5 }
  0x16   :  { %521 = vmatpush.bf16.msra.mxu1 %v901_v4 }
  0x76   :  { %v918_v6 = vpop.permute.xlu0 %166 }
  0x82   :  { %v90_v11 = vpop.f32.mrf.mxu0 }
  0x83   :  { %v91_v12 = vadd.f32 %v925_v10, %v90_v11 }
  0x86   :  { %v140_v7 = vpop.f32.mrf.mxu1 }
  0x87   :  { %v169_v8 = vadd.f32 %v918_v6, %v140_v7  ;;  %v144_v13 = vadd.f32 %v140_v7, %v91_v12 }
  0x89   :  { %171 = vrot.lane.b32.xlu0 %v169_v8, %s838_s11  ;;  %v723_v14 = vmul.f32 -1.442695, %v144_v13 }
  0x8a   :  { %v92_v42 = vpop.f32.mrf.mxu0 }
  0x8b   :  { %764 = vpow2.f32 %v723_v14  ;;  %v93_v43 = vadd.f32 %v925_v10, %v92_v42 }
  0x8e   :  { %v142_v9 = vpop.f32.mrf.mxu1 }
  0x91   :  { %v765_v15 = vpop.eup %764 }
  0x92   :  { %v148_v16 = vadd.f32 1.0, %v765_v15 }
  0x94   :  { %766 = vrcp.f32 %v148_v16  ;;  %v160_v22 = vand.u32 2147483648, %v148_v16  ;;  %vm154_vm2 = vweird.f32 %v148_v16  ;;  %v158_v23 = vand.u32 2147483647, %v148_v16 }
  0x96   :  { %v161_v25 = vor.u32 1.1754944e-38, %v160_v22  ;;  %vm159_vm4 = vcmp.eq.f32.partialorder %v158_v23, 8.507059e+37 }
  0x9a   :  { %v767_v17 = vpop.eup %766 }
  0x9b   :  { %v150_v18 = vmul.f32 %v767_v17, %v148_v16  ;;  %vm155_vm1 = vweird.f32 %v767_v17 }
  0x9c   :  { %vm156_vm3 = vmor %vm154_vm2, %vm155_vm1 }
  0x9d   :  { %v151_v19 = vsub.f32 1.0, %v150_v18 }
  0x9f   :  { %v152_v20 = vmul.f32 %v767_v17, %v151_v19 }
  0xa1   :  { %v153_v21 = vadd.f32 %v767_v17, %v152_v20 }
  0xa3   :  { %v157_v24 = vsel %vm156_vm3, %v767_v17, %v153_v21 }
  0xa4   :  { %v162_v27 = vsel %vm159_vm4, %v161_v25, %v157_v24 }
  0xfb   :  { %v172_v26 = vpop.permute.xlu0 %171 }
  0xfc   :  { %v174_v28 = vmul.f32 %v172_v26, %v162_v27 }
  0xfe   :  { %176 = vrot.lane.b32.xlu1 %v174_v28, %s838_s11 }
 0x170   :  { %v177_v29 = vpop.permute.xlu1 %176 }
 0x171   :  { %v179_v30 = vadd.f32 %v177_v29, %v91_v12  ;;  %v95_v12 = vpop.f32.mrf.mxu0 }
 0x172   :  { %v96_v13 = vadd.f32 %v925_v10, %v95_v12 }
 0x173   :  { %768 = vtanh.f32 %v179_v30 }
 0x179   :  { %v769_v31 = vpop.eup %768 }
 0x17a   :  { %v181_v32 = vsub.f32 0.0, %v769_v31 }
 0x17c   :  { %183 = vrot.lane.b32.xlu1 %v181_v32, %s840_s3 }
 0x1ee   :  { %v184_v33 = vpop.permute.xlu1 %183 }
 0x1ef   :  { %v186_v34 = vmul.f32 %v184_v33, %v162_v27 }
 0x1f1   :  { %188 = vrot.lane.b32.xlu2 %v186_v34, %s841_s4 }
 0x24b   :  { %v189_v35 = vpop.permute.xlu2 %188 }
 0x24c   :  { %v191_v36 = vadd.f32 %v769_v31, %v189_v35 }
 0x24e   :  { %v192_v37 = vpack.c.bf16 %v191_v36, %v191_v36 }
 0x250   :  { %194 = vrot.lane.b32.xlu2 %v192_v37, %s838_s11 }
 0x2aa   :  { %v195_v38 = vpop.permute.xlu2 %194 }
 0x2ab   :  { %724 = vmatmul.msk.bf16.vlgmr.msra.gmra.mxu2 %vm127_vm5, %v195_v38 }
 0x2ac   :  { %583 = vmatpush.bf16.msra.mxu2 %v886_v0 }
 0x2b0   :  { %584 = vmatpush.bf16.msra.mxu2 %v901_v4 }
 0x32e   :  { %v208_v39 = vpop.f32.mrf.mxu2 }
 0x32f   :  { %v232_v40 = vadd.f32 %v208_v39, %v918_v6  ;;  %v212_v44 = vadd.f32 %v208_v39, %v93_v43 }
 0x331   :  { %234 = vrot.lane.b32.xlu0 %v232_v40, %s838_s11  ;;  %v725_v45 = vmul.f32 -1.442695, %v212_v44 }
 0x333   :  { %770 = vpow2.f32 %v725_v45 }
 0x336   :  { %v210_v41 = vpop.f32.mrf.mxu2 }
 0x339   :  { %v771_v46 = vpop.eup %770 }
 0x33a   :  { %v216_v47 = vadd.f32 1.0, %v771_v46 }
 0x33c   :  { %772 = vrcp.f32 %v216_v47  ;;  %v228_v53 = vand.u32 2147483648, %v216_v47  ;;  %vm222_vm7 = vweird.f32 %v216_v47  ;;  %v226_v54 = vand.u32 2147483647, %v216_v47 }
 0x33e   :  { %v229_v56 = vor.u32 1.1754944e-38, %v228_v53  ;;  %vm227_vm9 = vcmp.eq.f32.partialorder %v226_v54, 8.507059e+37 }
 0x342   :  { %v773_v48 = vpop.eup %772 }
 0x343   :  { %v218_v49 = vmul.f32 %v773_v48, %v216_v47  ;;  %vm223_vm6 = vweird.f32 %v773_v48 }
 0x344   :  { %vm224_vm8 = vmor %vm222_vm7, %vm223_vm6 }
 0x345   :  { %v219_v50 = vsub.f32 1.0, %v218_v49 }
 0x347   :  { %v220_v51 = vmul.f32 %v773_v48, %v219_v50 }
 0x349   :  { %v221_v52 = vadd.f32 %v773_v48, %v220_v51 }
 0x34b   :  { %v225_v55 = vsel %vm224_vm8, %v773_v48, %v221_v52 }
 0x34c   :  { %v230_v58 = vsel %vm227_vm9, %v229_v56, %v225_v55 }
 0x3a3   :  { %v235_v57 = vpop.permute.xlu0 %234 }
 0x3a4   :  { %v237_v59 = vmul.f32 %v235_v57, %v230_v58 }
 0x3a6   :  { %239 = vrot.lane.b32.xlu1 %v237_v59, %s838_s11 }
 0x418   :  { %v240_v60 = vpop.permute.xlu1 %239 }
 0x419   :  { %v242_v61 = vadd.f32 %v240_v60, %v93_v43  ;;  %v97_v43 = vpop.f32.mrf.mxu0 }
 0x41a   :  { %v98_v44 = vadd.f32 %v925_v10, %v97_v43 }
 0x41b   :  { %774 = vtanh.f32 %v242_v61 }
 0x421   :  { %v775_v62 = vpop.eup %774 }
 0x422   :  { %v244_v63 = vsub.f32 %v191_v36, %v775_v62 }
 0x424   :  { %246 = vrot.lane.b32.xlu2 %v244_v63, %s840_s3 }
 0x47e   :  { %v247_v0 = vpop.permute.xlu2 %246 }
 0x47f   :  { %v249_v1 = vmul.f32 %v247_v0, %v230_v58 }
 0x481   :  { %251 = vrot.lane.b32.xlu0 %v249_v1, %s841_s4 }
 0x4f3   :  { %v252_v2 = vpop.permute.xlu0 %251 }
 0x4f4   :  { %v254_v3 = vadd.f32 %v775_v62, %v252_v2 }
 0x4f6   :  { %v255_v4 = vpack.c.bf16 %v254_v3, %v254_v3 }
 0x4f8   :  { %257 = vrot.lane.b32.xlu1 %v255_v4, %s838_s11 }
 0x56a   :  { %v258_v7 = vpop.permute.xlu1 %257 }
 0x56b   :  { %726 = vmatmul.msk.bf16.vlgmr.msra.gmra.mxu3 %vm127_vm5, %v258_v7  ;;  %v749_v7 = vld [vmem:[%s1015_s0 + $0x10] sm:$0xff] }
 0x56c   :  { %713 = vmatmul.msk.bf16.gmra.mxu0 %vm68_vm0, %v749_v7 }
 0x5ee   :  { %v271_v8 = vpop.f32.mrf.mxu3 }
 0x5ef   :  { %v295_v9 = vadd.f32 %v271_v8, %v918_v6  ;;  %v275_v14 = vadd.f32 %v271_v8, %v96_v13 }
 0x5f1   :  { %297 = vrot.lane.b32.xlu2 %v295_v9, %s838_s11  ;;  %v727_v15 = vmul.f32 -1.442695, %v275_v14 }
 0x5f3   :  { %776 = vpow2.f32 %v727_v15 }
 0x5f6   :  { %v273_v11 = vpop.f32.mrf.mxu3 }
 0x5f9   :  { %v777_v16 = vpop.eup %776 }
 0x5fa   :  { %v279_v17 = vadd.f32 1.0, %v777_v16 }
 0x5fc   :  { %778 = vrcp.f32 %v279_v17  ;;  %v291_v23 = vand.u32 2147483648, %v279_v17  ;;  %vm285_vm11 = vweird.f32 %v279_v17  ;;  %v289_v24 = vand.u32 2147483647, %v279_v17 }
 0x5fe   :  { %v292_v26 = vor.u32 1.1754944e-38, %v291_v23  ;;  %vm290_vm13 = vcmp.eq.f32.partialorder %v289_v24, 8.507059e+37 }
 0x602   :  { %v779_v18 = vpop.eup %778 }
 0x603   :  { %v281_v19 = vmul.f32 %v779_v18, %v279_v17  ;;  %vm286_vm10 = vweird.f32 %v779_v18 }
 0x604   :  { %vm287_vm12 = vmor %vm285_vm11, %vm286_vm10 }
 0x605   :  { %v282_v20 = vsub.f32 1.0, %v281_v19 }
 0x607   :  { %v283_v21 = vmul.f32 %v779_v18, %v282_v20 }
 0x609   :  { %v284_v22 = vadd.f32 %v779_v18, %v283_v21 }
 0x60b   :  { %v288_v25 = vsel %vm287_vm12, %v779_v18, %v284_v22 }
 0x60c   :  { %v293_v28 = vsel %vm290_vm13, %v292_v26, %v288_v25 }
 0x64b   :  { %v298_v27 = vpop.permute.xlu2 %297 }
 0x64c   :  { %v300_v29 = vmul.f32 %v298_v27, %v293_v28 }
 0x64e   :  { %302 = vrot.lane.b32.xlu0 %v300_v29, %s838_s11 }
 0x6c0   :  { %v303_v30 = vpop.permute.xlu0 %302 }
 0x6c1   :  { %v305_v31 = vadd.f32 %v303_v30, %v96_v13  ;;  %v100_v13 = vpop.f32.mrf.mxu0 }
 0x6c2   :  { %v101_v14 = vadd.f32 %v925_v10, %v100_v13 }
 0x6c3   :  { %780 = vtanh.f32 %v305_v31 }
 0x6c9   :  { %v781_v32 = vpop.eup %780 }
 0x6ca   :  { %v307_v33 = vsub.f32 %v254_v3, %v781_v32 }
 0x6cc   :  { %309 = vrot.lane.b32.xlu1 %v307_v33, %s840_s3 }
 0x73e   :  { %v310_v34 = vpop.permute.xlu1 %309 }
 0x73f   :  { %v312_v35 = vmul.f32 %v310_v34, %v293_v28 }
 0x741   :  { %314 = vrot.lane.b32.xlu2 %v312_v35, %s841_s4 }
 0x79b   :  { %v315_v36 = vpop.permute.xlu2 %314 }
 0x79c   :  { %v317_v37 = vadd.f32 %v781_v32, %v315_v36 }
 0x79e   :  { %v318_v38 = vpack.c.bf16 %v317_v37, %v317_v37 }
 0x7a0   :  { %320 = vrot.lane.b32.xlu0 %v318_v38, %s838_s11 }
 0x812   :  { %v321_v39 = vpop.permute.xlu0 %320 }
 0x813   :  { %728 = vmatmul.msk.bf16.vlgmr.msrb.gmra.mxu1 %vm127_vm5, %v321_v39 }
 0x890   :  { %v334_v40 = vpop.f32.mrf.mxu1 }
 0x891   :  { %v358_v41 = vadd.f32 %v334_v40, %v918_v6  ;;  %v338_v45 = vadd.f32 %v334_v40, %v98_v44 }
 0x893   :  { %360 = vrot.lane.b32.xlu1 %v358_v41, %s838_s11  ;;  %v729_v46 = vmul.f32 -1.442695, %v338_v45 }
 0x895   :  { %782 = vpow2.f32 %v729_v46 }
 0x898   :  { %v336_v42 = vpop.f32.mrf.mxu1 }
 0x89b   :  { %v783_v47 = vpop.eup %782 }
 0x89c   :  { %v342_v48 = vadd.f32 1.0, %v783_v47 }
 0x89e   :  { %784 = vrcp.f32 %v342_v48  ;;  %v354_v54 = vand.u32 2147483648, %v342_v48  ;;  %vm348_vm15 = vweird.f32 %v342_v48  ;;  %v352_v55 = vand.u32 2147483647, %v342_v48 }
 0x8a0   :  { %v355_v57 = vor.u32 1.1754944e-38, %v354_v54  ;;  %vm353_vm2 = vcmp.eq.f32.partialorder %v352_v55, 8.507059e+37 }
 0x8a4   :  { %v785_v49 = vpop.eup %784 }
 0x8a5   :  { %v344_v50 = vmul.f32 %v785_v49, %v342_v48  ;;  %vm349_vm14 = vweird.f32 %v785_v49 }
 0x8a6   :  { %vm350_vm1 = vmor %vm348_vm15, %vm349_vm14 }
 0x8a7   :  { %v345_v51 = vsub.f32 1.0, %v344_v50 }
 0x8a9   :  { %v346_v52 = vmul.f32 %v785_v49, %v345_v51 }
 0x8ab   :  { %v347_v53 = vadd.f32 %v785_v49, %v346_v52 }
 0x8ad   :  { %v351_v56 = vsel %vm350_vm1, %v785_v49, %v347_v53 }
 0x8ae   :  { %v356_v59 = vsel %vm353_vm2, %v355_v57, %v351_v56 }
 0x905   :  { %v361_v58 = vpop.permute.xlu1 %360 }
 0x906   :  { %v363_v60 = vmul.f32 %v361_v58, %v356_v59 }
 0x908   :  { %365 = vrot.lane.b32.xlu2 %v363_v60, %s838_s11 }
 0x962   :  { %v366_v61 = vpop.permute.xlu2 %365 }
 0x963   :  { %v368_v62 = vadd.f32 %v366_v61, %v98_v44  ;;  %v102_v44 = vpop.f32.mrf.mxu0 }
 0x964   :  { %v103_v45 = vadd.f32 %v925_v10, %v102_v44 }
 0x965   :  { %786 = vtanh.f32 %v368_v62 }
 0x96b   :  { %v787_v63 = vpop.eup %786 }
 0x96c   :  { %v370_v0 = vsub.f32 %v317_v37, %v787_v63 }
 0x96e   :  { %372 = vrot.lane.b32.xlu0 %v370_v0, %s840_s3 }
 0x9e0   :  { %v373_v1 = vpop.permute.xlu0 %372 }
 0x9e1   :  { %v375_v2 = vmul.f32 %v373_v1, %v356_v59 }
 0x9e3   :  { %377 = vrot.lane.b32.xlu1 %v375_v2, %s841_s4 }
 0xa55   :  { %v378_v3 = vpop.permute.xlu1 %377 }
 0xa56   :  { %v380_v4 = vadd.f32 %v787_v63, %v378_v3 }
 0xa58   :  { %v381_v5 = vpack.c.bf16 %v380_v4, %v380_v4 }
 0xa5a   :  { %383 = vrot.lane.b32.xlu2 %v381_v5, %s838_s11 }
 0xab4   :  { %v384_v8 = vpop.permute.xlu2 %383 }
 0xab5   :  { %730 = vmatmul.msk.bf16.vlgmr.msrb.gmra.mxu2 %vm127_vm5, %v384_v8 }
 0xb38   :  { %v397_v9 = vpop.f32.mrf.mxu2 }
 0xb39   :  { %v421_v11 = vadd.f32 %v397_v9, %v918_v6  ;;  %v401_v15 = vadd.f32 %v397_v9, %v101_v14 }
 0xb3b   :  { %423 = vrot.lane.b32.xlu0 %v421_v11, %s838_s11  ;;  %v731_v16 = vmul.f32 -1.442695, %v401_v15 }
 0xb3d   :  { %788 = vpow2.f32 %v731_v16 }
 0xb40   :  { %v399_v12 = vpop.f32.mrf.mxu2 }
 0xb43   :  { %v789_v17 = vpop.eup %788 }
 0xb44   :  { %v405_v18 = vadd.f32 1.0, %v789_v17 }
 0xb46   :  { %790 = vrcp.f32 %v405_v18  ;;  %v417_v24 = vand.u32 2147483648, %v405_v18  ;;  %vm411_vm4 = vweird.f32 %v405_v18  ;;  %v415_v25 = vand.u32 2147483647, %v405_v18 }
 0xb48   :  { %v418_v27 = vor.u32 1.1754944e-38, %v417_v24  ;;  %vm416_vm7 = vcmp.eq.f32.partialorder %v415_v25, 8.507059e+37 }
 0xb4c   :  { %v791_v19 = vpop.eup %790 }
 0xb4d   :  { %v407_v20 = vmul.f32 %v791_v19, %v405_v18  ;;  %vm412_vm3 = vweird.f32 %v791_v19 }
 0xb4e   :  { %vm413_vm6 = vmor %vm411_vm4, %vm412_vm3  ;;  %vm673_vm4 = vcmask 779264  }
 0xb4f   :  { %v408_v21 = vsub.f32 1.0, %v407_v20 }
 0xb51   :  { %v409_v22 = vmul.f32 %v791_v19, %v408_v21 }
 0xb53   :  { %v410_v23 = vadd.f32 %v791_v19, %v409_v22 }
 0xb55   :  { %v414_v26 = vsel %vm413_vm6, %v791_v19, %v410_v23 }
 0xb56   :  { %v419_v29 = vsel %vm416_vm7, %v418_v27, %v414_v26 }
 0xbad   :  { %v424_v28 = vpop.permute.xlu0 %423 }
 0xbae   :  { %v426_v30 = vmul.f32 %v424_v28, %v419_v29 }
 0xbb0   :  { %428 = vrot.lane.b32.xlu1 %v426_v30, %s838_s11 }
 0xc22   :  { %v429_v31 = vpop.permute.xlu1 %428 }
 0xc23   :  { %v431_v32 = vadd.f32 %v429_v31, %v101_v14 }
 0xc25   :  { %792 = vtanh.f32 %v431_v32 }
 0xc2b   :  { %v793_v33 = vpop.eup %792 }
 0xc2c   :  { %v433_v34 = vsub.f32 %v380_v4, %v793_v33  ;;  %v750_v4 = vld [vmem:[%s1015_s0 + $0x18] sm:$0xff] }
 0xc2d   :  { %714 = vmatmul.msk.bf16.gmra.mxu0 %vm68_vm0, %v750_v4  ;;  %v754_v4 = vld [vmem:[%s1020_s5] sm:$0xff] }
 0xc2e   :  { %435 = vrot.lane.b32.xlu2 %v433_v34, %s840_s3 }
 0xc88   :  { %v436_v35 = vpop.permute.xlu2 %435 }
 0xc89   :  { %v438_v36 = vmul.f32 %v436_v35, %v419_v29 }
 0xc8b   :  { %440 = vrot.lane.b32.xlu0 %v438_v36, %s841_s4 }
 0xcaa   :  { %v105_v14 = vpop.f32.mrf.mxu0 }
 0xcab   :  { %v106_v15 = vadd.f32 %v925_v10, %v105_v14 }
 0xcfd   :  { %v441_v37 = vpop.permute.xlu0 %440 }
 0xcfe   :  { %v443_v38 = vadd.f32 %v793_v33, %v441_v37 }
 0xd00   :  { %v444_v39 = vpack.c.bf16 %v443_v38, %v443_v38 }
 0xd02   :  { %446 = vrot.lane.b32.xlu1 %v444_v39, %s838_s11 }
 0xd74   :  { %v447_v40 = vpop.permute.xlu1 %446 }
 0xd75   :  { %732 = vmatmul.msk.bf16.vlgmr.msrb.gmra.mxu3 %vm127_vm5, %v447_v40 }
 0xdf8   :  { %v460_v41 = vpop.f32.mrf.mxu3 }
 0xdf9   :  { %v484_v42 = vadd.f32 %v460_v41, %v918_v6  ;;  %v464_v46 = vadd.f32 %v460_v41, %v103_v45 }
 0xdfb   :  { %486 = vrot.lane.b32.xlu2 %v484_v42, %s838_s11  ;;  %v733_v47 = vmul.f32 -1.442695, %v464_v46 }
 0xdfd   :  { %794 = vpow2.f32 %v733_v47 }
 0xe00   :  { %v462_v43 = vpop.f32.mrf.mxu3 }
 0xe03   :  { %v795_v48 = vpop.eup %794 }
 0xe04   :  { %v468_v49 = vadd.f32 1.0, %v795_v48 }
 0xe06   :  { %796 = vrcp.f32 %v468_v49  ;;  %v480_v55 = vand.u32 2147483648, %v468_v49  ;;  %vm474_vm9 = vweird.f32 %v468_v49  ;;  %v478_v56 = vand.u32 2147483647, %v468_v49 }
 0xe08   :  { %v481_v58 = vor.u32 1.1754944e-38, %v480_v55  ;;  %vm479_vm11 = vcmp.eq.f32.partialorder %v478_v56, 8.507059e+37 }
 0xe0c   :  { %v797_v50 = vpop.eup %796 }
 0xe0d   :  { %v470_v51 = vmul.f32 %v797_v50, %v468_v49  ;;  %vm475_vm8 = vweird.f32 %v797_v50 }
 0xe0e   :  { %vm476_vm10 = vmor %vm474_vm9, %vm475_vm8 }
 0xe0f   :  { %v471_v52 = vsub.f32 1.0, %v470_v51 }
 0xe11   :  { %v472_v53 = vmul.f32 %v797_v50, %v471_v52 }
 0xe13   :  { %v473_v54 = vadd.f32 %v797_v50, %v472_v53 }
 0xe15   :  { %v477_v57 = vsel %vm476_vm10, %v797_v50, %v473_v54 }
 0xe16   :  { %v482_v60 = vsel %vm479_vm11, %v481_v58, %v477_v57 }
 0xe55   :  { %v487_v59 = vpop.permute.xlu2 %486 }
 0xe56   :  { %v489_v61 = vmul.f32 %v487_v59, %v482_v60 }
 0xe58   :  { %491 = vrot.lane.b32.xlu0 %v489_v61, %s838_s11 }
 0xeca   :  { %v492_v62 = vpop.permute.xlu0 %491 }
 0xecb   :  { %v494_v63 = vadd.f32 %v492_v62, %v103_v45  ;;  %v107_v45 = vpop.f32.mrf.mxu0 }
 0xecc   :  { %v108_v46 = vadd.f32 %v925_v10, %v107_v45 }
 0xecd   :  { %798 = vtanh.f32 %v494_v63 }
 0xed3   :  { %v799_v0 = vpop.eup %798 }
 0xed4   :  { %v496_v1 = vsub.f32 %v443_v38, %v799_v0 }
 0xed6   :  { %498 = vrot.lane.b32.xlu1 %v496_v1, %s840_s3 }
 0xf48   :  { %v499_v2 = vpop.permute.xlu1 %498 }
 0xf49   :  { %v501_v3 = vmul.f32 %v499_v2, %v482_v60 }
 0xf4b   :  { %503 = vrot.lane.b32.xlu2 %v501_v3, %s841_s4  ;;  %v755_v3 = vld [vmem:[%s1020_s5 + $0x8] sm:$0xff] }
 0xf4c   :  { %666 = vmatpush.bf16.msra.mxu3 %v755_v3 }
 0xf50   :  { %667 = vmatpush.bf16.msra.mxu3 %v754_v4 }
 0xfa5   :  { %v504_v5 = vpop.permute.xlu2 %503 }
 0xfa6   :  { %v506_v7 = vadd.f32 %v799_v0, %v504_v5 }
 0xfa8   :  { %v507_v8 = vpack.c.bf16 %v506_v7, %v506_v7 }
 0xfaa   :  { %509 = vrot.lane.b32.xlu0 %v507_v8, %s838_s11 }
0x101c   :  { %v510_v9 = vpop.permute.xlu0 %509 }
0x101d   :  { %734 = vmatmul.msk.bf16.vlgmr.msra.gmra.mxu1 %vm127_vm5, %v510_v9 }
0x109a   :  { %v523_v11 = vpop.f32.mrf.mxu1 }
0x109b   :  { %v547_v12 = vadd.f32 %v523_v11, %v918_v6  ;;  %v527_v16 = vadd.f32 %v523_v11, %v106_v15  ;;  %v763_v11 = vld [vmem:[%s1021_s6] ss:$0 sm:$0xff] }
0x109d   :  { %549 = vrot.lane.b32.xlu1 %v547_v12, %s838_s11  ;;  %v735_v17 = vmul.f32 -1.442695, %v527_v16 }
0x109f   :  { %800 = vpow2.f32 %v735_v17 }
0x10a2   :  { %v525_v13 = vpop.f32.mrf.mxu1 }
0x10a5   :  { %v801_v18 = vpop.eup %800 }
0x10a6   :  { %v531_v19 = vadd.f32 1.0, %v801_v18 }
0x10a8   :  { %802 = vrcp.f32 %v531_v19  ;;  %v543_v25 = vand.u32 2147483648, %v531_v19  ;;  %vm537_vm12 = vweird.f32 %v531_v19  ;;  %v541_v26 = vand.u32 2147483647, %v531_v19 }
0x10aa   :  { %v544_v28 = vor.u32 1.1754944e-38, %v543_v25  ;;  %vm542_vm14 = vcmp.eq.f32.partialorder %v541_v26, 8.507059e+37 }
0x10ae   :  { %v803_v20 = vpop.eup %802 }
0x10af   :  { %v533_v21 = vmul.f32 %v803_v20, %v531_v19  ;;  %vm538_vm0 = vweird.f32 %v803_v20 }
0x10b0   :  { %vm539_vm13 = vmor %vm537_vm12, %vm538_vm0 }
0x10b1   :  { %v534_v22 = vsub.f32 1.0, %v533_v21 }
0x10b3   :  { %v535_v23 = vmul.f32 %v803_v20, %v534_v22 }
0x10b5   :  { %v536_v24 = vadd.f32 %v803_v20, %v535_v23 }
0x10b7   :  { %v540_v27 = vsel %vm539_vm13, %v803_v20, %v536_v24 }
0x10b8   :  { %v545_v30 = vsel %vm542_vm14, %v544_v28, %v540_v27 }
0x110f   :  { %v550_v29 = vpop.permute.xlu1 %549 }
0x1110   :  { %v552_v31 = vmul.f32 %v550_v29, %v545_v30 }
0x1112   :  { %554 = vrot.lane.b32.xlu2 %v552_v31, %s838_s11 }
0x116c   :  { %v555_v32 = vpop.permute.xlu2 %554 }
0x116d   :  { %v557_v33 = vadd.f32 %v555_v32, %v106_v15 }
0x116f   :  { %804 = vtanh.f32 %v557_v33 }
0x1175   :  { %v805_v34 = vpop.eup %804 }
0x1176   :  { %v559_v35 = vsub.f32 %v506_v7, %v805_v34 }
0x1178   :  { %561 = vrot.lane.b32.xlu0 %v559_v35, %s840_s3 }
0x11ea   :  { %v562_v36 = vpop.permute.xlu0 %561 }
0x11eb   :  { %v564_v37 = vmul.f32 %v562_v36, %v545_v30 }
0x11ed   :  { %566 = vrot.lane.b32.xlu1 %v564_v37, %s841_s4 }
0x125f   :  { %v567_v38 = vpop.permute.xlu1 %566 }
0x1260   :  { %v569_v39 = vadd.f32 %v805_v34, %v567_v38 }
0x1262   :  { %v570_v40 = vpack.c.bf16 %v569_v39, %v569_v39 }
0x1264   :  { %572 = vrot.lane.b32.xlu2 %v570_v40, %s838_s11 }
0x12be   :  { %v573_v41 = vpop.permute.xlu2 %572 }
0x12bf   :  { %736 = vmatmul.msk.bf16.vlgmr.msra.gmra.mxu2 %vm127_vm5, %v573_v41 }
0x1342   :  { %v586_v42 = vpop.f32.mrf.mxu2 }
0x1343   :  { %v610_v43 = vadd.f32 %v586_v42, %v918_v6  ;;  %v590_v47 = vadd.f32 %v586_v42, %v108_v46 }
0x1345   :  { %612 = vrot.lane.b32.xlu0 %v610_v43, %s838_s11  ;;  %v737_v48 = vmul.f32 -1.442695, %v590_v47 }
0x1347   :  { %806 = vpow2.f32 %v737_v48 }
0x134a   :  { %v588_v44 = vpop.f32.mrf.mxu2 }
0x134d   :  { %v807_v49 = vpop.eup %806 }
0x134e   :  { %v594_v50 = vadd.f32 1.0, %v807_v49 }
0x1350   :  { %808 = vrcp.f32 %v594_v50  ;;  %v606_v56 = vand.u32 2147483648, %v594_v50  ;;  %vm600_vm1 = vweird.f32 %v594_v50  ;;  %v604_v6 = vand.u32 2147483647, %v594_v50 }
0x1352   :  { %v607_v58 = vor.u32 1.1754944e-38, %v606_v56  ;;  %vm605_vm3 = vcmp.eq.f32.partialorder %v604_v6, 8.507059e+37 }
0x1356   :  { %v809_v51 = vpop.eup %808 }
0x1357   :  { %v596_v52 = vmul.f32 %v809_v51, %v594_v50  ;;  %vm601_vm15 = vweird.f32 %v809_v51 }
0x1358   :  { %vm602_vm2 = vmor %vm600_vm1, %vm601_vm15 }
0x1359   :  { %v597_v53 = vsub.f32 1.0, %v596_v52 }
0x135b   :  { %v598_v54 = vmul.f32 %v809_v51, %v597_v53 }
0x135d   :  { %v599_v55 = vadd.f32 %v809_v51, %v598_v54 }
0x135f   :  { %v603_v57 = vsel %vm602_vm2, %v809_v51, %v599_v55 }
0x1360   :  { %v608_v59 = vsel %vm605_vm3, %v607_v58, %v603_v57 }
0x13b7   :  { %v613_v10 = vpop.permute.xlu0 %612 }
0x13b8   :  { %v615_v60 = vmul.f32 %v613_v10, %v608_v59 }
0x13ba   :  { %617 = vrot.lane.b32.xlu1 %v615_v60, %s838_s11 }
0x142c   :  { %v618_v61 = vpop.permute.xlu1 %617 }
0x142d   :  { %v620_v62 = vadd.f32 %v618_v61, %v108_v46 }
0x142f   :  { %810 = vtanh.f32 %v620_v62 }
0x1435   :  { %v811_v63 = vpop.eup %810 }
0x1436   :  { %v622_v0 = vsub.f32 %v569_v39, %v811_v63 }
0x1438   :  { %624 = vrot.lane.b32.xlu2 %v622_v0, %s840_s3 }
0x1492   :  { %v625_v1 = vpop.permute.xlu2 %624 }
0x1493   :  { %v627_v2 = vmul.f32 %v625_v1, %v608_v59 }
0x1495   :  { %629 = vrot.lane.b32.xlu0 %v627_v2, %s841_s4 }
0x1507   :  { %v630_v5 = vpop.permute.xlu0 %629 }
0x1508   :  { %v632_v7 = vadd.f32 %v811_v63, %v630_v5 }
0x150a   :  { %v633_v8 = vpack.c.bf16 %v632_v7, %v632_v7 }
0x150c   :  { %643 = vrot.lane.b32.xlu1 %v633_v8, %s838_s11 }
0x157e   :  { %v644_v9 = vpop.permute.xlu1 %643 }
0x157f   :  { %746 = vmatmul.msk.bf16.vlgmr.msra.gmra.mxu3 %vm127_vm5, %v644_v9 }
0x1602   :  { %v669_v12 = vpop.f32.mrf.mxu3 }
0x1603   :  { %v670_v13 = vadd.f32 %v763_v11, %v669_v12 }
0x1605   :  { %674 = vst.msk [vmem:[#allocation2] sm:$0x3] %vm673_vm4, %v670_v13 }
0x1606   :  { %685 = dma.vmem_to_hbm [thread:$0]  %s681_s24, 32, %s683_s27, [#allocation3]  }
0x160a   :  { %v671_v14 = vpop.f32.mrf.mxu3 }
0x160b   :  { %836 = dma.done.wait [#allocation3], 32  }
0x160c   :  { %837 = vsyncadd [#allocation3], 4294967264 }
0x160d   :  { %690 = vsyncpa [#allocation3], 1 }

</bundles_post_ra>
